<compile_context>
chip_gen: v6e
topology: v6e:2x2x1
jax: 0.10.0
libtpu: 0.0.40
codegen_flags: <defaults>
</compile_context>

<pallas_src>
import numpy as np
import jax
import jax.numpy as jnp
from jax.experimental import pallas as pl
from jax.experimental.pallas import tpu as pltpu


# ----------------------------- Rs bookkeeping (setup-time, numpy) ------------

def convention(Rs):
    out = []
    for r in Rs:
        if isinstance(r, int):
            mul, l, p = 1, r, 0
        elif len(r) == 2:
            (mul, l), p = r, 0
        else:
            mul, l, p = r
        assert isinstance(mul, int) and mul >= 0
        assert isinstance(l, int) and l >= 0
        assert p in [0, 1, -1]
        out.append((mul, l, p))
    return out


def simplify(Rs):
    out = []
    for mul, l, p in convention(Rs):
        if out and out[-1][1:] == (l, p):
            out[-1] = (out[-1][0] + mul, l, p)
        elif mul > 0:
            out.append((mul, l, p))
    return out


def dim(Rs):
    return sum(mul * (2 * l + 1) for mul, l, _ in convention(Rs))


def selection_rule(l1, p1, l2, p2):
    # default o3.selection_rule: all l in |l1-l2| .. l1+l2
    return list(range(abs(l1 - l2), l1 + l2 + 1))


def wigner_3j(l_out, l1, l2):
    """Real SO(3)-invariant 3-tensor (Frobenius norm 1).
    Values tabulated for the (l_out, l1, l2) combos required by the Rs_in used
    in this script; basis convention for l=2 is fixed in-script (synthetic
    parameters, deterministic)."""
    key = (l_out, l1, l2)
    if key == (0, 0, 0):
        return np.ones((1, 1, 1))
    if key == (1, 0, 1):
        return np.eye(3).reshape(3, 1, 3) / np.sqrt(3.0)
    if key == (1, 1, 0):
        return np.eye(3).reshape(3, 3, 1) / np.sqrt(3.0)
    if key == (0, 1, 1):
        return np.eye(3).reshape(1, 3, 3) / np.sqrt(3.0)
    if key == (1, 1, 1):
        eps = np.zeros((3, 3, 3))
        eps[0, 1, 2] = eps[1, 2, 0] = eps[2, 0, 1] = 1.0
        eps[0, 2, 1] = eps[2, 1, 0] = eps[1, 0, 2] = -1.0
        return eps / np.sqrt(6.0)
    if key == (2, 1, 1):
        s2, s6 = np.sqrt(2.0), np.sqrt(6.0)
        basis = np.zeros((5, 3, 3))
        basis[0, 0, 1] = basis[0, 1, 0] = 1.0 / s2
        basis[1, 0, 2] = basis[1, 2, 0] = 1.0 / s2
        basis[2, 1, 2] = basis[2, 2, 1] = 1.0 / s2
        basis[3, 0, 0], basis[3, 1, 1] = 1.0 / s2, -1.0 / s2
        basis[4, 0, 0] = basis[4, 1, 1] = -1.0 / s6
        basis[4, 2, 2] = 2.0 / s6
        return basis / np.sqrt(5.0)
    # TODO(synk): general real wigner_3j (arbitrary l) not tabulated here.
    raise NotImplementedError(f"wigner_3j{key} not tabulated in this script")


def tensor_square_dense(Rs_in, normalization="component"):
    """Dense version of rs.tensor_square's sparse mixing matrix build."""
    Rs_in = simplify(Rs_in)
    Rs_out = []
    for i, (mul1, l1, p1) in enumerate(Rs_in):
        for l_out in selection_rule(l1, p1, l1, p1):
            if l_out % 2 == 0:
                Rs_out.append((mul1 * (mul1 + 1) // 2, l_out, p1 ** 2))
            else:
                Rs_out.append((mul1 * (mul1 - 1) // 2, l_out, p1 ** 2))
        for mul2, l2, p2 in Rs_in[i + 1:]:
            for l_out in selection_rule(l1, p1, l2, p2):
                Rs_out.append((mul1 * mul2, l_out, p1 * p2))
    Rs_out = simplify(Rs_out)

    d_in = dim(Rs_in)
    Q = np.zeros((dim(Rs_out), d_in, d_in))
    index_out = 0
    index_1 = 0
    for i, (mul1, l1, p1) in enumerate(Rs_in):
        dim1 = mul1 * (2 * l1 + 1)
        for l_out in selection_rule(l1, p1, l1, p1):
            I = np.eye(mul1 ** 2).reshape(mul1 ** 2, mul1, mul1)
            uv = np.argwhere(I)[:, 1:]
            if l_out % 2 == 0:
                I = I[uv[:, 0] <= uv[:, 1]]
            else:
                I = I[uv[:, 0] < uv[:, 1]]
            if I.shape[0] == 0:
                continue
            C = wigner_3j(l_out, l1, l1)
            if normalization == "component":
                C = C * (2 * l_out + 1) ** 0.5
            if normalization == "norm":
                C = C * (2 * l1 + 1) ** 0.5 * (2 * l1 + 1) ** 0.5
            d_out = I.shape[0] * (2 * l_out + 1)
            m = np.einsum("wuv,kij->wkuivj", I, C).reshape(d_out, dim1, dim1)
            Q[index_out:index_out + d_out,
              index_1:index_1 + dim1,
              index_1:index_1 + dim1] += m
            index_out += d_out
        index_2 = index_1 + dim1
        for mul2, l2, p2 in Rs_in[i + 1:]:
            dim2 = mul2 * (2 * l2 + 1)
            for l_out in selection_rule(l1, p1, l2, p2):
                I = np.eye(mul1 * mul2).reshape(mul1 * mul2, mul1, mul2)
                C = wigner_3j(l_out, l1, l2)
                if normalization == "component":
                    C = C * (2 * l_out + 1) ** 0.5
                if normalization == "norm":
                    C = C * (2 * l1 + 1) ** 0.5 * (2 * l2 + 1) ** 0.5
                d_out = I.shape[0] * (2 * l_out + 1)
                m = np.einsum("wuv,kij->wkuivj", I, C).reshape(d_out, dim1, dim2)
                Q[index_out:index_out + d_out,
                  index_1:index_1 + dim1,
                  index_2:index_2 + dim2] += m
                index_out += d_out
            index_2 += dim2
        index_1 += dim1
    return Rs_out, Q  # Q: (dim_out, dim_in, dim_in)


def sort_Rs(Rs):
    """Stable sort by (l, p); returns sorted Rs and row permutation (sorted = Q[perm])."""
    Rs_in = simplify(Rs)
    xs = []
    j = 0
    for mul, l, p in Rs_in:
        d = mul * (2 * l + 1)
        xs.append((l, p, mul, j, d))
        j += d
    Rs_out = []
    perm = []
    for l, p, mul, j, d in sorted(xs):
        Rs_out.append((mul, l, p))
        perm.extend(range(j, j + d))
    return Rs_out, np.asarray(perm, dtype=np.int64)


# ----------------------------- Pallas kernel ---------------------------------

def _tensor_square_kernel(f_ref, q_ref, o_ref):
    # f_ref : (TZ, n)            features tile
    # q_ref : (n*n, dim_out)     Qflat[i*n + j, k] = Q[k, i, j]   (grid-resident)
    # o_ref : (TZ, dim_out)
    f = f_ref[...].astype(jnp.float32)          # single hoisted f32 cast
    n = f.shape[1]
    # Per-row outer product laid out as (TZ, n*n), column index i*n + j = f_i * f_j.
    # Built by lane-concatenation of n broadcast-multiplies (no 3-D reshape).
    fo = jnp.concatenate([f[:, i:i + 1] * f for i in range(n)], axis=-1)
    # Single (TZ, n*n) @ (n*n, dim_out) contraction on the MXU.
    o_ref[...] = jnp.dot(fo, q_ref[...],
                         preferred_element_type=jnp.float32).astype(o_ref.dtype)


def tensor_square_forward(features, qflat, *, tz_max=2048):
    *size, n = features.shape
    z = 1
    for s in size:
        z *= s
    nn, dim_out = qflat.shape
    assert nn == n * n
    f2d = features.reshape(z, n)

    # Large Z tiles amortize the ~0.35us fixed per-grid-step overhead.  With
    # lane padding to 128, the f32 tiles cost ~tz*(0.5+0.5+0.5+0.5) KB
    # (f, outer, out, double-buffers), so tz=2048 stays far below the v5e
    # 16 MiB scoped-VMEM default (and the v6e/v7x 32 MiB default).
    tz = min(tz_max, ((z + 7) // 8) * 8)          # multiple of 8 sublanes
    grid = (pl.cdiv(z, tz),)                      # partial last block is masked

    out = pl.pallas_call(
        _tensor_square_kernel,
        out_shape=jax.ShapeDtypeStruct((z, dim_out), features.dtype),
        grid=grid,
        in_specs=[
            pl.BlockSpec((tz, n), lambda i: (i, 0)),
            # Qflat is tiny and reused by every step: constant block index.
            pl.BlockSpec((nn, dim_out), lambda i: (0, 0)),
        ],
        out_specs=pl.BlockSpec((tz, dim_out), lambda i: (i, 0)),
        compiler_params=pltpu.CompilerParams(
            dimension_semantics=("parallel",)),
    )(f2d, qflat)

    return out.reshape(*size, dim_out)


# ----------------------------- Module wrapper ---------------------------------

class TensorSquare:
    def __init__(self, Rs_in):
        self.Rs_in = simplify(Rs_in)
        Rs_out, Q = tensor_square_dense(self.Rs_in, normalization="component")
        Rs_sorted, perm = sort_Rs(Rs_out)
        self.Rs_out = simplify(Rs_sorted)
        Q = Q[perm]                                   # sorted mixing matrix
        self.dim_in = dim(self.Rs_in)
        self.dim_out = dim(self.Rs_out)
        n = self.dim_in
        self.Q = jnp.asarray(Q, dtype=jnp.float32)    # (dim_out, n, n), reference
        # Qflat[i*n + j, k] = Q[k, i, j]  -> one (Z, n*n) @ (n*n, dim_out) matmul
        self.Qflat = jnp.asarray(
            np.transpose(Q, (1, 2, 0)).reshape(n * n, self.dim_out),
            dtype=jnp.float32)

    def __call__(self, features):
        return tensor_square_forward(features, self.Qflat)


if __name__ == "__main__":
    # Rs_in = 2 scalars (l=0) + 1 vector (l=1)  -> channels = 5
    Rs_in = [(2, 0), (1, 1)]
    mod = TensorSquare(Rs_in)  # Rs_out = [(4,0,0),(2,1,0),(1,2,0)] -> dim_out = 15

    key = jax.random.PRNGKey(0)
    k1, k2 = jax.random.split(key)

    # main check
    features = jax.random.normal(k1, (2, 8, mod.dim_in), dtype=jnp.float32)
    out = jax.block_until_ready(mod(features))
    f2d = features.reshape(-1, mod.dim_in)
    ref = jnp.einsum("kij,zi,zj->zk", mod.Q, f2d, f2d).reshape(2, 8, mod.dim_out)
    assert out.shape == (2, 8, mod.dim_out), out.shape
    assert out.dtype == features.dtype
    assert jnp.allclose(out, ref, atol=1e-4, rtol=1e-4)

    # ragged Z check: exercises the partial-last-block path (no wrapper pad/slice)
    features2 = jax.random.normal(k2, (3, 7, mod.dim_in), dtype=jnp.float32)
    out2 = jax.block_until_ready(mod(features2))
    f2d2 = features2.reshape(-1, mod.dim_in)
    ref2 = jnp.einsum("kij,zi,zj->zk", mod.Q, f2d2, f2d2).reshape(3, 7, mod.dim_out)
    assert jnp.allclose(out2, ref2, atol=1e-4, rtol=1e-4)

    print("KERNEL_OK")
</pallas_src>

<mosaic_0001>
module attributes {stable_mosaic.version = 11 : i64} {
  func.func @_tensor_square_kernel(%arg0: i32, %arg1: memref<16x5xf32, #tpu.memory_space<vmem>>, %arg2: memref<25x15xf32, #tpu.memory_space<vmem>>, %arg3: memref<16x15xf32, #tpu.memory_space<vmem>>) attributes {dimension_semantics = [#tpu.dimension_semantics<parallel>], iteration_bounds = array<i64: 1>, scalar_prefetch = 0 : i64, scratch_operands = 0 : i64, tpu.core_type = #tpu.core_type<tc>, window_params = [{transform_indices = @transform_0, window_bounds = array<i64: 16, 5>}, {pipeline_mode = #tpu.pipeline_mode<synchronous>, transform_indices = @transform_1, window_bounds = array<i64: 25, 15>}, {transform_indices = @transform_2, window_bounds = array<i64: 16, 15>}]} {
    %c0 = arith.constant 0 : index
    %c0_0 = arith.constant 0 : index
    %0 = vector.load %arg1[%c0, %c0_0] : memref<16x5xf32, #tpu.memory_space<vmem>>, vector<16x5xf32>
    %1 = vector.extract_strided_slice %0 {offsets = [0, 0], sizes = [16, 1], strides = [1, 1]} : vector<16x5xf32> to vector<16x1xf32>
    %2 = vector.broadcast %1 : vector<16x1xf32> to vector<16x5xf32>
    %3 = arith.mulf %2, %0 : vector<16x5xf32>
    %4 = vector.extract_strided_slice %0 {offsets = [0, 1], sizes = [16, 1], strides = [1, 1]} : vector<16x5xf32> to vector<16x1xf32>
    %5 = vector.broadcast %4 : vector<16x1xf32> to vector<16x5xf32>
    %6 = arith.mulf %5, %0 : vector<16x5xf32>
    %7 = vector.extract_strided_slice %0 {offsets = [0, 2], sizes = [16, 1], strides = [1, 1]} : vector<16x5xf32> to vector<16x1xf32>
    %8 = vector.broadcast %7 : vector<16x1xf32> to vector<16x5xf32>
    %9 = arith.mulf %8, %0 : vector<16x5xf32>
    %10 = vector.extract_strided_slice %0 {offsets = [0, 3], sizes = [16, 1], strides = [1, 1]} : vector<16x5xf32> to vector<16x1xf32>
    %11 = vector.broadcast %10 : vector<16x1xf32> to vector<16x5xf32>
    %12 = arith.mulf %11, %0 : vector<16x5xf32>
    %13 = vector.extract_strided_slice %0 {offsets = [0, 4], sizes = [16, 1], strides = [1, 1]} : vector<16x5xf32> to vector<16x1xf32>
    %14 = vector.broadcast %13 : vector<16x1xf32> to vector<16x5xf32>
    %15 = arith.mulf %14, %0 : vector<16x5xf32>
    %16 = tpu.concatenate %3, %6, %9, %12, %15 in 1 : vector<16x5xf32>, vector<16x5xf32>, vector<16x5xf32>, vector<16x5xf32>, vector<16x5xf32> -> vector<16x25xf32>
    %c0_1 = arith.constant 0 : index
    %c0_2 = arith.constant 0 : index
    %17 = vector.load %arg2[%c0_1, %c0_2] : memref<25x15xf32, #tpu.memory_space<vmem>>, vector<25x15xf32>
    %cst = arith.constant dense<0.000000e+00> : vector<16x15xf32>
    %18 = tpu.matmul %16, %17, %cst {dimension_numbers = #tpu.dot_dimension_numbers<[1], [0], [0], [1], [0, 0, 1, 1], [], []>} : vector<16x25xf32>, vector<25x15xf32>, vector<16x15xf32> -> vector<16x15xf32>
    %c0_3 = arith.constant 0 : index
    %c0_4 = arith.constant 0 : index
    %19 = vector.load %arg3[%c0_3, %c0_4] : memref<16x15xf32, #tpu.memory_space<vmem>>, vector<16x15xf32>
    tpu.vector_store %arg3[%c0_3, %c0_4], %18 {strides = array<i32>} : memref<16x15xf32, #tpu.memory_space<vmem>>, vector<16x15xf32>,
    return
  }
  func.func @transform_0(%arg0: i32) -> (i32, i32) {
    %c0_i32 = arith.constant 0 : i32
    %c0_i32_0 = arith.constant 0 : i32
    return %arg0, %c0_i32 : i32, i32
  }
  func.func @transform_1(%arg0: i32) -> (i32, i32) {
    %c0_i32 = arith.constant 0 : i32
    %c0_i32_0 = arith.constant 0 : i32
    %c0_i32_1 = arith.constant 0 : i32
    return %c0_i32, %c0_i32_0 : i32, i32
  }
  func.func @transform_2(%arg0: i32) -> (i32, i32) {
    %c0_i32 = arith.constant 0 : i32
    %c0_i32_0 = arith.constant 0 : i32
    return %arg0, %c0_i32 : i32, i32
  }
}

</mosaic_0001>

<bundles_post_ra>
// kernel: tpu_custom_call.1
= control target key start
LH: loop header
LB: loop body
LE: loop exit
PB: predicated region body
PF: predicated region fallthrough
CT: control target
= control target key end

     0   :  { %v279_v1 = vmov 2   ;;  %v280_v2 = vmov 1   ;;  %s355_s0 = inlined_call_operand.vmem [shape: f32[16,5], index: 0, kind: input, shape index: {}]   ;;  %s356_s1 = inlined_call_operand.vmem [shape: f32[25,15], index: 1, kind: input, shape index: {}]   ;;  %s357_s2 = inlined_call_operand.hbm [shape: f32[16,15], index: 2, kind: output, shape index: {}]  }
   0x1   :  { %v309_v0 = vld [vmem:[%s355_s0] sm:$0xff]  ;;  %251 = vset.pattern.permute.xlu1 %v279_v1  ;;  %250 = vset.pattern.permute.xlu0 %v280_v2 }
   0x2   :  { %7 = vsyncpa [#allocation3], 0  ;;  %37 = vperm.xlu1 %251, %v309_v0   ;;  %27 = vperm.xlu0 %250, %v309_v0   ;;  %v316_v3 = vld [vmem:[%s355_s0 + $0x8] sm:$0xff]  ;;  %v281_v4 = vmov 3   ;;  %v282_v5 = vmov 4   ;;  %v283_v6 = vmov 0  }
   0x3   :  { %v113_v7 = vld [vmem:[%s356_s1 + $0x18] sm:$0x1]  ;;  %vm121_vm0 = vcmask 1040384   ;;  %v112_v8 = vld [vmem:[%s356_s1 + $0x10] sm:$0xff]  ;;  %v111_v12 = vld [vmem:[%s356_s1 + $0x8] sm:$0xff]  ;;  %s284_s18 = smov 5  }
   0x4   :  { %227 = vmatprep.subr.msk.mxu0 %vm121_vm0, %v113_v7  ;;  %v110_v13 = vld [vmem:[%s356_s1] sm:$0xff]  ;;  %s285_s21 = smov 10   ;;  %s286_s1 = smov 15   ;;  %vm98_vm1 = vcmask 39936   ;;  %vm101_vm2 = vcmask 80896   ;;  %vm104_vm3 = vcmask 121856  }
   0x5   :  { %228 = vmatpush3.msk.msra.mxu0 %vm121_vm0, %v113_v7  ;;  %s287_s22 = smov 20   ;;  %vm107_vm4 = vcmask 162816   ;;  %vm114_vm5 = vcmask 203776   ;;  %s288_s23 = smov [#allocation2]  }
   0x6   :  { %41 = vperm.xlu1 %251, %v316_v3   ;;  %31 = vperm.xlu0 %250, %v316_v3   ;;  %s207_s24 = sshll.u32 %s288_s23, 4  ;;  %s208_s24 = int_to_ptr.vmem [resolvable:$true] %s207_s24 }
   0x7   :  { %229 = vmatprep.subr.mxu0 %v112_v8  ;;  %s257_s25 = scalar_lea.vmem %s208_s24, 256  ;;  %p262_p1 = scmp.lt.s32.totalorder %s208_s24, %s208_s24 }
   0x8   :  { %230 = vmatpush3.msra.mxu0 %v112_v8  ;;  %p258_p0 = scmp.ne.s32.totalorder %s208_s24, %s257_s25  ;;  %p263_p2 = scmp.lt.s32.totalorder %s257_s25, %s257_s25 }
   0x9   :  { %231 = vmatprep.subr.mxu0 %v111_v12 }
   0xa   :  { %253 = vset.pattern.permute.xlu1 %v281_v4  ;;  %252 = vset.pattern.permute.xlu0 %v281_v4  ;;  %p264_p3 = por %p263_p2, %p262_p1 }
   0xb   :  { %51 = vperm.xlu1 %253, %v316_v3   ;;  %47 = vperm.xlu0 %252, %v309_v0  }
   0xc   :  { %232 = vmatpush3.msra.mxu0 %v111_v12  ;;  %p265_p4 = pnand %p264_p3, %p258_p0 }
   0xd   :  { %233 = vmatprep.subr.mxu0 %v110_v13 }
   0xe   :  { %234 = vmatpush3.msra.mxu0 %v110_v13 }
   0xf   :  { %254 = vset.pattern.permute.xlu1 %v282_v5  ;;  %255 = vset.pattern.permute.xlu0 %v282_v5 }
  0x10   :  { %57 = vperm.xlu1 %254, %v309_v0   ;;  %61 = vperm.xlu0 %255, %v316_v3  }
  0x14   :  { %256 = vset.pattern.permute.xlu1 %v283_v6 }
  0x15   :  { %16 = vperm.xlu1 %256, %v309_v0  }
  0x19   :  { %21 = vperm.xlu1 %256, %v316_v3  }
  0x7d   :  { %v38_v9 = vpop.permute.xlu1 %37  ;;  %v28_v10 = vpop.permute.xlu0 %27 }
  0x7e   :  { %v34_v11 = vmul.f32 %v28_v10, %v309_v0  ;;  %v44_v15 = vmul.f32 %v38_v9, %v309_v0 }
  0x80   :  { %68 = vrot.lane.b32.xlu0 %v34_v11, %s284_s18 }
  0x81   :  { %v32_v14 = vpop.permute.xlu0 %31  ;;  %v42_v16 = vpop.permute.xlu1 %41 }
  0x82   :  { %v35_v17 = vmul.f32 %v32_v14, %v316_v3  ;;  %v45_v18 = vmul.f32 %v42_v16, %v316_v3 }
  0x84   :  { %76 = vrot.lane.b32.xlu0 %v44_v15, %s285_s21  ;;  %70 = vrot.lane.b32.xlu1 %v35_v17, %s284_s18 }
  0x86   :  { %v48_v19 = vpop.permute.xlu0 %47  ;;  %v52_v20 = vpop.permute.xlu1 %51 }
  0x87   :  { %v54_v21 = vmul.f32 %v48_v19, %v309_v0  ;;  %v55_v22 = vmul.f32 %v52_v20, %v316_v3 }
  0x88   :  { %78 = vrot.lane.b32.xlu1 %v45_v18, %s285_s21 }
  0x89   :  { %84 = vrot.lane.b32.xlu0 %v54_v21, %s286_s1 }
  0x8b   :  { %v58_v23 = vpop.permute.xlu1 %57  ;;  %v62_v24 = vpop.permute.xlu0 %61 }
  0x8c   :  { %v64_v25 = vmul.f32 %v58_v23, %v309_v0  ;;  %86 = vrot.lane.b32.xlu1 %v55_v22, %s286_s1  ;;  %v65_v26 = vmul.f32 %v62_v24, %v316_v3 }
  0x8e   :  { %92 = vrot.lane.b32.xlu0 %v64_v25, %s287_s22 }
  0x90   :  { %94 = vrot.lane.b32.xlu1 %v65_v26, %s287_s22  ;;  %v17_v27 = vpop.permute.xlu1 %16 }
  0x91   :  { %v24_v34 = vmul.f32 %v17_v27, %v309_v0 }
  0x94   :  { %v22_v28 = vpop.permute.xlu1 %21 }
  0x95   :  { %v25_v35 = vmul.f32 %v22_v28, %v316_v3 }
  0xf2   :  { %v69_v29 = vpop.permute.xlu0 %68 }
  0xf3   :  { %v99_v36 = vsel %vm98_vm1, %v24_v34, %v69_v29 }
  0xf6   :  { %v71_v30 = vpop.permute.xlu1 %70  ;;  %v77_v31 = vpop.permute.xlu0 %76 }
  0xf7   :  { %v102_v38 = vsel %vm101_vm2, %v99_v36, %v77_v31  ;;  %v100_v39 = vsel %vm98_vm1, %v25_v35, %v71_v30 }
  0xfa   :  { %v79_v32 = vpop.permute.xlu1 %78 }
  0xfb   :  { %v85_v33 = vpop.permute.xlu0 %84  ;;  %v103_v42 = vsel %vm101_vm2, %v100_v39, %v79_v32 }
  0xfc   :  { %v105_v40 = vsel %vm104_vm3, %v102_v38, %v85_v33 }
  0xfe   :  { %v87_v37 = vpop.permute.xlu1 %86 }
  0xff   :  { %v106_v44 = vsel %vm104_vm3, %v103_v42, %v87_v37 }
 0x100   :  { %v93_v41 = vpop.permute.xlu0 %92 }
 0x101   :  { %v108_v43 = vsel %vm107_vm4, %v105_v40, %v93_v41 }
 0x102   :  { %v95_v45 = vpop.permute.xlu1 %94  ;;  %235 = vmatprep.mubr.msk.f32.mxu0 %vm114_vm5, %v108_v43 }
 0x103   :  { %v109_v46 = vsel %vm107_vm4, %v106_v44, %v95_v45 }
 0x104   :  { %236 = vmatmul.mubr.msk.f32.vlgmr.msra.gmra.mxu0 %vm114_vm5, %v109_v46 }
 0x1c4   :  { %v237_v47 = vpop.f32.mrf.mxu0 }
 0x1c5   :  { %201 = vst.msk [vmem:[#allocation2 + $0x8] sm:$0xff] %vm104_vm3, %v237_v47 }
 0x1c6   :  { %v191_v48 = vpop.f32.mrf.mxu0 }
 0x1c7   :  { %200 = vst.msk [vmem:[#allocation2] sm:$0xff] %vm104_vm3, %v191_v48 }
 0x1c8   :  { %268 = shalt.err (!%p265_p4)
}
 0x1c9   :  { %s289_s26 = smov 128   ;;  %s290_s27 = smov 8  }
 0x1ca   :  { %213 = dma.vmem_to_hbm [thread:$0]  %s208_s24, 256, %s357_s2, [#allocation3], %s289_s26, %s289_s26, %s290_s27  }
 0x1cb   :  { %277 = dma.done.wait [#allocation3], 256  }
 0x1cc   :  { %278 = vsyncadd [#allocation3], 4294967040 }
 0x1cd   :  { %217 = vsyncpa [#allocation3], 1 }

</bundles_post_ra>
